<compile_context>
chip_gen: v7x
topology: tpu7x:2x2x1
jax: 0.10.0
libtpu: 0.0.40
codegen_flags: <defaults>
</compile_context>

<pallas_src>
import functools

import numpy as np
import jax
import jax.numpy as jnp
from jax.experimental import pallas as pl
from jax.experimental.pallas import tpu as pltpu


def _round_up(a, b):
    return (a + b - 1) // b * b


# ---------------------------------------------------------------------------
# Core Pallas kernel:  y = act((x @ W) * scale + shift)
# ---------------------------------------------------------------------------
def _fused_linear_kernel(x_ref, w_ref, scale_ref, shift_ref, o_ref, acc_ref, *, act):
    k = pl.program_id(1)

    @pl.when(k == 0)
    def _():
        acc_ref[...] = jnp.zeros_like(acc_ref)

    acc_ref[...] += jnp.dot(x_ref[...], w_ref[...],
                            preferred_element_type=jnp.float32)

    @pl.when(k == pl.num_programs(1) - 1)
    def _():
        y = acc_ref[...] * scale_ref[...] + shift_ref[...]
        if act == "relu":
            y = jnp.maximum(y, 0.0)
        elif act == "sigmoid":
            y = jax.nn.sigmoid(y)
        o_ref[...] = y.astype(o_ref.dtype)


def fused_linear(x2d, w, scale, shift, act="none", *, tm=256, tk=2304):
    """act((x2d @ w) * scale + shift) with a Pallas TPU kernel.

    x2d: (M, K) f32, w: (K, N) f32, scale/shift: (N,) f32.
    Pads M to the row tile, N to a lane-dense multiple of 128, and streams K
    in chunks with a VMEM accumulator when K is large.
    """
    M, K = x2d.shape
    Kw, N = w.shape
    assert Kw == K

    # Lane-dense output width.
    Np = _round_up(max(N, 128), 128)
    # Row tile: as big as possible (<= tm); adapts down for tiny M.
    tm_eff = min(tm, _round_up(M, 8))
    Mp = _round_up(M, tm_eff)
    # K tiling: single step for small K, otherwise stream tk-sized chunks.
    if K <= tk:
        tk_eff, Kp = K, K
    else:
        tk_eff = tk
        Kp = _round_up(K, tk_eff)

    xp = x2d if (Mp == M and Kp == K) else jnp.pad(x2d, ((0, Mp - M), (0, Kp - K)))
    wp = w if (Kp == K and Np == N) else jnp.pad(w, ((0, Kp - K), (0, Np - N)))
    scp = jnp.pad(scale.astype(jnp.float32).reshape(1, N), ((0, 0), (0, Np - N)))
    shp = jnp.pad(shift.astype(jnp.float32).reshape(1, N), ((0, 0), (0, Np - N)))

    grid = (Mp // tm_eff, Kp // tk_eff)
    flops = 2 * Mp * Kp * Np
    bytes_accessed = 4 * (Mp * Kp + Kp * Np + Mp * Np + 2 * Np)

    out = pl.pallas_call(
        functools.partial(_fused_linear_kernel, act=act),
        out_shape=jax.ShapeDtypeStruct((Mp, Np), jnp.float32),
        grid_spec=pltpu.PrefetchScalarGridSpec(
            num_scalar_prefetch=0,
            grid=grid,
            in_specs=[
                pl.BlockSpec((tm_eff, tk_eff), lambda i, k: (i, k)),   # x row/K tile
                pl.BlockSpec((tk_eff, Np), lambda i, k: (k, 0)),       # W K-chunk
                pl.BlockSpec((1, Np), lambda i, k: (0, 0)),            # scale
                pl.BlockSpec((1, Np), lambda i, k: (0, 0)),            # shift
            ],
            out_specs=pl.BlockSpec((tm_eff, Np), lambda i, k: (i, 0)),
            scratch_shapes=[pltpu.VMEM((tm_eff, Np), jnp.float32)],
        ),
        compiler_params=pltpu.CompilerParams(
            dimension_semantics=("parallel", "arbitrary"),
        ),
        cost_estimate=pl.CostEstimate(flops=flops, transcendentals=0,
                                      bytes_accessed=bytes_accessed),
    )(xp, wp, scp, shp)

    return out[:M, :N]


def ref_linear(x2d, w, scale, shift, act="none"):
    """Plain-JAX reference with identical signature (for correctness checks)."""
    y = jnp.dot(x2d, w, precision=jax.lax.Precision.HIGHEST) * scale + shift
    if act == "relu":
        y = jnp.maximum(y, 0.0)
    elif act == "sigmoid":
        y = jax.nn.sigmoid(y)
    return y


# ---------------------------------------------------------------------------
# Module building blocks (all heavy math routed through `linear`)
# ---------------------------------------------------------------------------
def conv3x3(x_nhwc, p, act, linear):
    """3x3 / stride 1 / padding 1 conv (+ folded bias & eval BatchNorm) + act."""
    B, H, W, Cin = x_nhwc.shape
    w = p["w"]                                   # (3, 3, Cin, Cout)
    Cout = w.shape[-1]
    xp = jnp.pad(x_nhwc, ((0, 0), (1, 1), (1, 1), (0, 0)))
    patches = jnp.concatenate(
        [xp[:, dy:dy + H, dx:dx + W, :] for dy in range(3) for dx in range(3)],
        axis=-1).reshape(B * H * W, 9 * Cin)
    w2d = w.reshape(9 * Cin, Cout)
    scale = p["bn_scale"]
    shift = p["bn_scale"] * p["b"] + p["bn_shift"]
    y = linear(patches, w2d, scale, shift, act)
    return y.reshape(B, H, W, Cout)


def channel_attention(x_nhwc, p, linear):
    """ChannelAttention: global avg pool -> FC/ReLU -> FC/sigmoid -> scale x."""
    B, H, W, C = x_nhwc.shape
    pooled = jnp.mean(x_nhwc, axis=(1, 2))       # AdaptiveAvgPool2d(1) -> (B, C)
    hidden = p["fc1"].shape[1]
    h = linear(pooled, p["fc1"], jnp.ones((hidden,), jnp.float32),
               jnp.zeros((hidden,), jnp.float32), "relu")
    att = linear(h, p["fc2"], jnp.ones((C,), jnp.float32),
                 jnp.zeros((C,), jnp.float32), "sigmoid")
    return x_nhwc * att[:, None, None, :]


def _interp_matrix(n_in, n_out):
    # PyTorch bilinear upsample, align_corners=True -> separable 1-D linear weights.
    if n_in == 1:
        return jnp.ones((n_out, 1), jnp.float32)
    src = np.arange(n_out, dtype=np.float64) * (n_in - 1) / (n_out - 1)
    lo = np.clip(np.floor(src).astype(np.int64), 0, n_in - 2)
    frac = src - lo
    A = np.zeros((n_out, n_in), np.float64)
    A[np.arange(n_out), lo] = 1.0 - frac
    A[np.arange(n_out), lo + 1] += frac
    return jnp.asarray(A, jnp.float32)


def upsample_bilinear(x_nhwc, scale):
    # TODO(synk): separable bilinear interpolation left to XLA (tiny, memory-bound);
    # all matmul-heavy work runs through the Pallas fused_linear kernel.
    B, H, W, C = x_nhwc.shape
    Ah = _interp_matrix(H, H * scale)
    Aw = _interp_matrix(W, W * scale)
    y = jnp.einsum("oh,bhwc->bowc", Ah, x_nhwc)
    y = jnp.einsum("pw,bowc->bopc", Aw, y)
    return y


def pointwise(x2d, w, linear):
    """1x1 conv (no bias, no BN, no activation) on (B, Cin) vectors."""
    n = w.shape[1]
    return linear(x2d, w, jnp.ones((n,), jnp.float32),
                  jnp.zeros((n,), jnp.float32), "none")


# ---------------------------------------------------------------------------
# Parameters (deterministic init mirroring the module's init_param)
# ---------------------------------------------------------------------------
def _conv_params(key, cin, cout, bn=True, eps=1e-5):
    w = 0.01 * jax.random.normal(key, (3, 3, cin, cout), jnp.float32)  # normal(std=0.01)
    b = jnp.zeros((cout,), jnp.float32)
    if bn:
        gamma = jnp.ones((cout,), jnp.float32)
        beta = jnp.zeros((cout,), jnp.float32)
        mean = jnp.zeros((cout,), jnp.float32)
        var = jnp.ones((cout,), jnp.float32)
        bn_scale = gamma / jnp.sqrt(var + eps)
        bn_shift = beta - mean * bn_scale
    else:
        bn_scale = jnp.ones((cout,), jnp.float32)
        bn_shift = jnp.zeros((cout,), jnp.float32)
    return dict(w=w, b=b, bn_scale=bn_scale, bn_shift=bn_shift)


def _ca_params(key, c, ratio=16):
    k1, k2 = jax.random.split(key)
    bd1 = 1.0 / (c ** 0.5)
    bd2 = 1.0 / ((c // ratio) ** 0.5)
    fc1 = jax.random.uniform(k1, (c, c // ratio), jnp.float32, -bd1, bd1)
    fc2 = jax.random.uniform(k2, (c // ratio, c), jnp.float32, -bd2, bd2)
    return dict(fc1=fc1, fc2=fc2)


def init_regression_params(key):
    keys = jax.random.split(key, 24)
    it = iter(keys)
    p = {}
    p["v1"] = _conv_params(next(it), 256, 128)
    p["v2"] = _conv_params(next(it), 512, 256)
    p["v3"] = _conv_params(next(it), 1024, 512)
    p["ca2"] = dict(_ca_params(next(it), 512), conv=_conv_params(next(it), 512, 512))
    p["ca1"] = dict(_ca_params(next(it), 256), conv=_conv_params(next(it), 256, 256))
    p["ca0"] = dict(_ca_params(next(it), 128), conv=_conv_params(next(it), 128, 128))
    p["res2"] = [_conv_params(next(it), 512, 256),
                 _conv_params(next(it), 256, 128),
                 _conv_params(next(it), 128, 1, bn=False)]
    p["res1"] = [_conv_params(next(it), 256, 128),
                 _conv_params(next(it), 128, 64),
                 _conv_params(next(it), 64, 1, bn=False)]
    p["res0"] = [_conv_params(next(it), 128, 64),
                 _conv_params(next(it), 64, 1, bn=False)]
    p["conv1"] = 0.01 * jax.random.normal(next(it), (1024, 512), jnp.float32)
    p["conv2"] = 0.01 * jax.random.normal(next(it), (512, 256), jnp.float32)
    p["conv3"] = 0.01 * jax.random.normal(next(it), (256, 128), jnp.float32)
    p["conv4"] = 0.01 * jax.random.normal(next(it), (128, 1), jnp.float32)
    return p


# ---------------------------------------------------------------------------
# Regression forward (eval mode)
# ---------------------------------------------------------------------------
def regression_forward(params, xs, cls, *, linear=fused_linear):
    # TODO(synk): training-mode stochastic branches (Dropout2d / FeatureDrop /
    # FeatureNoise decoders) are not implemented; this is the eval-mode forward.
    x0, x1, x2, x3 = xs              # NHWC: (B,S,S,128), (B,S/2,S/2,256), (B,S/4,S/4,512), (B,S/8,S/8,1024)
    cls0, cls1, cls2 = cls           # (B,256), (B,512), (B,1024)

    def ca_block(x, p):              # Sequential(ChannelAttention, Conv3x3, BN, ReLU)
        return conv3x3(channel_attention(x, p, linear), p["conv"], "relu", linear)

    def v_block(x, p):               # Sequential(Upsample x2, Conv3x3, BN, ReLU)
        return conv3x3(upsample_bilinear(x, 2), p, "relu", linear)

    x2_1 = ca_block(x2, params["ca2"]) + v_block(x3, params["v3"])
    x1_1 = ca_block(x1, params["ca1"]) + v_block(x2_1, params["v2"])
    x0_1 = ca_block(x0, params["ca0"]) + v_block(x1_1, params["v1"])

    def res_head(x, plist):
        for p in plist:
            x = conv3x3(x, p, "relu", linear)
        return x

    y2 = res_head(upsample_bilinear(x2_1, 4), params["res2"])
    y1 = res_head(upsample_bilinear(x1_1, 2), params["res1"])
    y0 = res_head(x0_1, params["res0"])

    c1, c2, c3, c4 = params["conv1"], params["conv2"], params["conv3"], params["conv4"]
    yc2 = pointwise(pointwise(pointwise(pointwise(cls2, c1, linear), c2, linear), c3, linear), c4, linear)
    yc1 = pointwise(pointwise(pointwise(cls1, c2, linear), c3, linear), c4, linear)
    yc0 = pointwise(pointwise(cls0, c3, linear), c4, linear)

    to_nchw = lambda t: jnp.transpose(t, (0, 3, 1, 2))
    ys = [to_nchw(y0), to_nchw(y1), to_nchw(y2)]
    ycs = [jnp.squeeze(yc0), jnp.squeeze(yc1), jnp.squeeze(yc2)]
    return ys, ycs


if __name__ == "__main__":
    key = jax.random.PRNGKey(0)
    kp, kx = jax.random.split(key)

    # --- unit check of the Pallas kernel (exercises M/K/N padding + K streaming) ---
    ku = jax.random.split(kx, 8)
    xt = jax.random.normal(ku[0], (37, 300), jnp.float32)
    wt = 0.05 * jax.random.normal(ku[1], (300, 70), jnp.float32)
    sc = jax.random.normal(ku[2], (70,), jnp.float32)
    sh = jax.random.normal(ku[3], (70,), jnp.float32)
    got = fused_linear(xt, wt, sc, sh, "relu", tm=16, tk=128)
    want = ref_linear(xt, wt, sc, sh, "relu")
    assert jnp.allclose(got, want, atol=1e-4, rtol=1e-4), "fused_linear mismatch"

    # --- small Regression forward (eval mode) ---
    B, S = 2, 16
    params = init_regression_params(kp)
    kxs = jax.random.split(ku[4], 7)
    x0 = jax.random.normal(kxs[0], (B, S, S, 128), jnp.float32)
    x1 = jax.random.normal(kxs[1], (B, S // 2, S // 2, 256), jnp.float32)
    x2 = jax.random.normal(kxs[2], (B, S // 4, S // 4, 512), jnp.float32)
    x3 = jax.random.normal(kxs[3], (B, S // 8, S // 8, 1024), jnp.float32)
    cls0 = jax.random.normal(kxs[4], (B, 256), jnp.float32)
    cls1 = jax.random.normal(kxs[5], (B, 512), jnp.float32)
    cls2 = jax.random.normal(kxs[6], (B, 1024), jnp.float32)

    fwd = jax.jit(functools.partial(regression_forward, linear=fused_linear))
    ys, ycs = fwd(params, (x0, x1, x2, x3), (cls0, cls1, cls2))
    ys, ycs = jax.block_until_ready((ys, ycs))

    # shape checks (match the PyTorch module's outputs)
    assert ys[0].shape == (B, 1, S, S)
    assert ys[1].shape == (B, 1, S, S)
    assert ys[2].shape == (B, 1, S, S)
    assert ycs[0].shape == (B,) and ycs[1].shape == (B,) and ycs[2].shape == (B,)

    # full-forward correctness check against a plain-JAX reference
    ys_ref, ycs_ref = regression_forward(params, (x0, x1, x2, x3),
                                         (cls0, cls1, cls2), linear=ref_linear)
    for a, b in zip(ys, ys_ref):
        assert jnp.allclose(a, b, atol=2e-3, rtol=2e-3), "spatial head mismatch"
    for a, b in zip(ycs, ycs_ref):
        assert jnp.allclose(a, b, atol=2e-3, rtol=2e-3), "cls head mismatch"

    print("KERNEL_OK")
</pallas_src>

<mosaic_0001>
module attributes {stable_mosaic.version = 11 : i64} {
  func.func @_fused_linear_kernel(%arg0: i32, %arg1: i32, %arg2: memref<16x128xf32, #tpu.memory_space<vmem>>, %arg3: memref<128x128xf32, #tpu.memory_space<vmem>>, %arg4: memref<1x128xf32, #tpu.memory_space<vmem>>, %arg5: memref<1x128xf32, #tpu.memory_space<vmem>>, %arg6: memref<16x128xf32, #tpu.memory_space<vmem>>, %arg7: memref<16x128xf32, #tpu.memory_space<vmem>>) attributes {dimension_semantics = [#tpu.dimension_semantics<parallel>, #tpu.dimension_semantics<arbitrary>], iteration_bounds = array<i64: 3, 3>, scalar_prefetch = 0 : i64, scratch_operands = 1 : i64, tpu.core_type = #tpu.core_type<tc>, window_params = [{transform_indices = @transform_0, window_bounds = array<i64: 16, 128>}, {transform_indices = @transform_1, window_bounds = array<i64: 128, 128>}, {pipeline_mode = #tpu.pipeline_mode<synchronous>, transform_indices = @transform_2, window_bounds = array<i64: 1, 128>}, {pipeline_mode = #tpu.pipeline_mode<synchronous>, transform_indices = @transform_3, window_bounds = array<i64: 1, 128>}, {transform_indices = @transform_4, window_bounds = array<i64: 16, 128>}]} {
    %c0_i32 = arith.constant 0 : i32
    %0 = arith.cmpi eq, %arg1, %c0_i32 : i32
    %1 = arith.extui %0 : i1 to i32
    %c0_i32_0 = arith.constant 0 : i32
    %2 = arith.cmpi ne, %1, %c0_i32_0 : i32
    scf.if %2 {
      %cst_9 = arith.constant 0.000000e+00 : f32
      %12 = vector.broadcast %cst_9 : f32 to vector<16x128xf32>
      %c0_10 = arith.constant 0 : index
      %c0_11 = arith.constant 0 : index
      %13 = vector.load %arg7[%c0_10, %c0_11] : memref<16x128xf32, #tpu.memory_space<vmem>>, vector<16x128xf32>
      tpu.vector_store %arg7[%c0_10, %c0_11], %12 {strides = array<i32>} : memref<16x128xf32, #tpu.memory_space<vmem>>, vector<16x128xf32>,
    } else {
    }
    %c0 = arith.constant 0 : index
    %c0_1 = arith.constant 0 : index
    %3 = vector.load %arg7[%c0, %c0_1] : memref<16x128xf32, #tpu.memory_space<vmem>>, vector<16x128xf32>
    %c0_2 = arith.constant 0 : index
    %c0_3 = arith.constant 0 : index
    %4 = vector.load %arg2[%c0_2, %c0_3] : memref<16x128xf32, #tpu.memory_space<vmem>>, vector<16x128xf32>
    %c0_4 = arith.constant 0 : index
    %c0_5 = arith.constant 0 : index
    %5 = vector.load %arg3[%c0_4, %c0_5] : memref<128x128xf32, #tpu.memory_space<vmem>>, vector<128x128xf32>
    %cst = arith.constant dense<0.000000e+00> : vector<16x128xf32>
    %6 = tpu.matmul %4, %5, %cst {dimension_numbers = #tpu.dot_dimension_numbers<[1], [0], [0], [1], [0, 0, 1, 1], [], []>} : vector<16x128xf32>, vector<128x128xf32>, vector<16x128xf32> -> vector<16x128xf32>
    %7 = arith.addf %3, %6 : vector<16x128xf32>
    %c0_6 = arith.constant 0 : index
    %c0_7 = arith.constant 0 : index
    %8 = vector.load %arg7[%c0_6, %c0_7] : memref<16x128xf32, #tpu.memory_space<vmem>>, vector<16x128xf32>
    tpu.vector_store %arg7[%c0_6, %c0_7], %7 {strides = array<i32>} : memref<16x128xf32, #tpu.memory_space<vmem>>, vector<16x128xf32>,
    %c2_i32 = arith.constant 2 : i32
    %9 = arith.cmpi eq, %arg1, %c2_i32 : i32
    %10 = arith.extui %9 : i1 to i32
    %c0_i32_8 = arith.constant 0 : i32
    %11 = arith.cmpi ne, %10, %c0_i32_8 : i32
    scf.if %11 {
      %c0_9 = arith.constant 0 : index
      %c0_10 = arith.constant 0 : index
      %12 = vector.load %arg7[%c0_9, %c0_10] : memref<16x128xf32, #tpu.memory_space<vmem>>, vector<16x128xf32>
      %c0_11 = arith.constant 0 : index
      %c0_12 = arith.constant 0 : index
      %13 = vector.load %arg4[%c0_11, %c0_12] : memref<1x128xf32, #tpu.memory_space<vmem>>, vector<1x128xf32>
      %14 = vector.broadcast %13 : vector<1x128xf32> to vector<16x128xf32>
      %15 = arith.mulf %12, %14 : vector<16x128xf32>
      %c0_13 = arith.constant 0 : index
      %c0_14 = arith.constant 0 : index
      %16 = vector.load %arg5[%c0_13, %c0_14] : memref<1x128xf32, #tpu.memory_space<vmem>>, vector<1x128xf32>
      %17 = vector.broadcast %16 : vector<1x128xf32> to vector<16x128xf32>
      %18 = arith.addf %15, %17 : vector<16x128xf32>
      %cst_15 = arith.constant 0.000000e+00 : f32
      %19 = vector.broadcast %cst_15 : f32 to vector<16x128xf32>
      %20 = arith.maximumf %18, %19 : vector<16x128xf32>
      %c0_16 = arith.constant 0 : index
      %c0_17 = arith.constant 0 : index
      %21 = vector.load %arg6[%c0_16, %c0_17] : memref<16x128xf32, #tpu.memory_space<vmem>>, vector<16x128xf32>
      tpu.vector_store %arg6[%c0_16, %c0_17], %20 {strides = array<i32>} : memref<16x128xf32, #tpu.memory_space<vmem>>, vector<16x128xf32>,
    } else {
    }
    return
  }
  func.func @transform_0(%arg0: i32, %arg1: i32) -> (i32, i32) {
    %c0_i32 = arith.constant 0 : i32
    return %arg0, %arg1 : i32, i32
  }
  func.func @transform_1(%arg0: i32, %arg1: i32) -> (i32, i32) {
    %c0_i32 = arith.constant 0 : i32
    %c0_i32_0 = arith.constant 0 : i32
    return %arg1, %c0_i32 : i32, i32
  }
  func.func @transform_2(%arg0: i32, %arg1: i32) -> (i32, i32) {
    %c0_i32 = arith.constant 0 : i32
    %c0_i32_0 = arith.constant 0 : i32
    %c0_i32_1 = arith.constant 0 : i32
    return %c0_i32, %c0_i32_0 : i32, i32
  }
  func.func @transform_3(%arg0: i32, %arg1: i32) -> (i32, i32) {
    %c0_i32 = arith.constant 0 : i32
    %c0_i32_0 = arith.constant 0 : i32
    %c0_i32_1 = arith.constant 0 : i32
    return %c0_i32, %c0_i32_0 : i32, i32
  }
  func.func @transform_4(%arg0: i32, %arg1: i32) -> (i32, i32) {
    %c0_i32 = arith.constant 0 : i32
    %c0_i32_0 = arith.constant 0 : i32
    return %arg0, %c0_i32 : i32, i32
  }
}

</mosaic_0001>

<bundles_post_ra>
// kernel: tpu_custom_call.1
= control target key start
LH: loop header
LB: loop body
LE: loop exit
PB: predicated region body
PF: predicated region fallthrough
CT: control target
= control target key end

     0   :  { %s1409_s0 = inlined_call_operand.hbm [shape: f32[48,384], index: 0, kind: input, shape index: {}]   ;;  %s1410_s1 = inlined_call_operand.hbm [shape: f32[384,128], index: 1, kind: input, shape index: {}]   ;;  %s1411_s2 = inlined_call_operand.vmem [shape: f32[1,128], index: 2, kind: input, shape index: {}]   ;;  %s1412_s3 = inlined_call_operand.vmem [shape: f32[1,128], index: 3, kind: input, shape index: {}]   ;;  %s1413_s4 = inlined_call_operand.hbm [shape: f32[48,128], index: 4, kind: output, shape index: {}]  }
   0x1   :  { %1426 = sst [smem:[#allocation17_spill]] %s1409_s0 }
   0x2   :  { %1427 = sst [smem:[#allocation18_spill]] %s1411_s2 }
   0x3   :  { %1428 = sst [smem:[#allocation19_spill]] %s1412_s3 }
   0x4   :  { %1429 = sst [smem:[#allocation20_spill]] %s1413_s4 }
   0x5   :  { %9 = vsyncpa [#allocation4], 0 }
   0x6   :  { %11 = vsyncpa [#allocation4 + $0x1], 0 }
   0x7   :  { %12 = vsyncpa [#allocation7], 0 }
   0x8   :  { %14 = vsyncpa [#allocation7 + $0x1], 0 }
   0x9   :  { %15 = vsyncpa [#allocation5], 0 }
   0xa   :  { %17 = vsyncpa [#allocation5 + $0x1], 0  ;;  %s1026_s15 = smov 0   ;;  %s1028_s16 = smov 0  }
   0xb   :  { %s1030_s17 = smov 0   ;;  %s1032_s18 = smov 0  }
   0xc   :  { %s1034_s19 = smov 0   ;;  %s1036_s20 = smov 0  }
   0xd   :  { %s1038_s21 = smov 0   ;;  %s1040_s22 = smov 0  }
   0xe   :  { %s1042_s23 = smov 0   ;;  %s1044_s24 = smov 0  }
   0xf   :  { %s1046_s25 = smov 0   ;;  %s1048_s26 = smov 0  }
  0x10   :  { %s1050_s27 = smov 0   ;;  %s1052_s28 = smov 0  }
  0x11 LB: > { %1430 = sst [smem:[#allocation12_spill]] %s978_s25  ;;  %s32_s29 = sadd.s32 1, %s982_s26  ;;  %s990_s28 = sphi %s1052_s28, %s23_s28   ;;  %s986_s27 = sphi %s1050_s27, %s1462_s27   ;;  %s982_s26 = sphi %s1048_s26, %s1461_s26   ;;  %s978_s25 = sphi %s1046_s25, %s1460_s25   ;;  %s974_s24 = sphi %s1044_s24, %s1459_s24   ;;  %s970_s23 = sphi %s1042_s23, %s1471_s23   ;;  %s966_s22 = sphi %s1040_s22, %s1470_s22   ;;  %s962_s21 = sphi %s1038_s21, %s1469_s21   ;;  %s958_s20 = sphi %s1036_s20, %s1468_s20   ;;  %s954_s19 = sphi %s1034_s19, %s1467_s19   ;;  %s950_s18 = sphi %s1032_s18, %s1466_s18   ;;  %s946_s17 = sphi %s1030_s17, %s1465_s17   ;;  %s942_s16 = sphi %s1028_s16, %s1464_s16   ;;  %s938_s15 = sphi %s1026_s15, %s1463_s15  }
  0x12   : > { %1431 = sst [smem:[#allocation13_spill]] %s982_s26  ;;  %s35_s30 = sadd.s32 1, %s986_s27 }
  0x13   : > { %1432 = sst [smem:[#allocation14_spill]] %s986_s27  ;;  %p33_p0 = scmp.ge.s32.totalorder %s32_s29, 3 }
  0x14   : > { %s44_s5 = sadd.s32 1, %s970_s23  ;;  %p51_p1 = scmp.ne.s32.totalorder %s970_s23, %s966_s22 }
  0x15   : > { %p1418_p2 = scmp.eq.s32.totalorder %s990_s28, 0  ;;  %s1473_s29 = smov (%p33_p0, %s32_s29), 0 }
  0x16   : > { %1433 = sst [smem:[#allocation15_spill]] %s1473_s29  ;;  %s1475_s30 = smov (!%p33_p0, %s35_s30), %s986_s27 }
  0x17   : > { %s1107_s6 = ssub.s32 %s982_s26, %s1473_s29  ;;  %p1111_p3 = por %p1418_p2, %p51_p1 }
  0x18   : > { %p37_p4 = scmp.ge.s32.totalorder %s1475_s30, 3  ;;  %s138_s8 = sadd.s32 1, %s946_s17 }
  0x19   : > { %p1417_p7 = scmp.lt.s32.totalorder %s990_s28, 9  ;;  %s181_s10 = sand.u32 1, %s970_s23  }
  0x1a   : > { %s1477_s30 = smov (%p37_p4, %s1475_s30), 0  ;;  %s535_s14 = sshll.u32 %s181_s10, 4 }
  0x1b   : > { %1435 = sst [smem:[#allocation16_spill]] %s1477_s30  ;;  %s39_s9 = ssub.s32 %s986_s27, %s1477_s30 }
  0x1c   : > { %s41_s11 = sor.u32 %s1107_s6, %s39_s9  ;;  %p136_p8 = scmp.eq.s32.totalorder %s39_s9, 0 }
  0x1d   : > { %p42_p9 = scmp.eq.s32.totalorder %s41_s11, 0  ;;  %s642_s29 = smul.u32 6, %s986_s27 }
  0x1e   : > { %s1127_s12 = scalar_select %p136_p8, %s946_s17, %s138_s8  }
  0x1f   : > { %s1130_s13 = scalar_select %p42_p9, %s970_s23, %s44_s5  }
  0x20   : > { %p1137_p10 = pnand %p1417_p7, %p1111_p3  ;;  %s191_s30 = sadd.s32 %s982_s26, %s642_s29 }
  0x21   : > { %s185_s25 = scalar_lea.vmem [#allocation3], %s535_s14  ;;  %s538_s2 = sshll.u32 %s191_s30, 7 }
  0x22   : > { %s194_s3 = sshll.u32 %s185_s25, 4  ;;  %s1437_s0 = sld [smem:[#allocation17_spill]]  ;;  %s1142_s3 = int_to_ptr.vmem [resolvable:$true] %s194_s3 }
  0x23   : > { %p542_p11 = scmp.ge.s32.totalorder %s990_s28, 1  ;;  %s1150_s7 = scalar_lea.sflag [#allocation4], %s181_s10 }
  0x24   : > { %p782_p13 = pneg %p1137_p10 }
  0x28   : > { %s1147_s5 = scalar_lea.hbm %s1437_s0, %s538_s2  ;;  %s785_s2 = scalar_lea.hbm %s1437_s0, 2304 }
  0x29   : > { %s780_s11 = scalar_lea.hbm %s1147_s5, 256  ;;  %p786_p3 = scmp.lt.u32.totalorder %s1147_s5, %s1437_s0 }
  0x2a   : > { %p781_p12 = scmp.ne.s32.totalorder %s1147_s5, %s780_s11  ;;  %p787_p4 = scmp.lt.u32.totalorder %s785_s2, %s780_s11 }
  0x2b   : > { %p789_p9 = scmp.lt.u32.totalorder %s780_s11, %s1147_s5 }
  0x2c   : > { %p783_p0 = pnand %p782_p13, %p781_p12  ;;  %p788_p8 = por %p787_p4, %p786_p3 }
  0x2e   : > { %p784_p1 = pneg %p783_p0  ;;  %p790_p7 = por %p789_p9, %p788_p8 }
  0x30   : > { %p791_p2 = pnand %p790_p7, %p784_p1 }
  0x32   : > { %794 = shalt.err (!%p791_p2)
}
  0x33   : > { %s795_s10 = scalar_lea.vmem %s1142_s3, 256  ;;  %s992_s8 = smov [#allocation3]  }
  0x34   : > { %p796_p12 = scmp.ne.s32.totalorder %s1142_s3, %s795_s10  ;;  %s800_s9 = sshll.u32 %s992_s8, 4  ;;  %s801_s9 = int_to_ptr.vmem [resolvable:$false] %s800_s9 }
  0x35   : > { %s802_s25 = scalar_lea.vmem %s801_s9, 512  ;;  %p803_p6 = scmp.lt.s32.totalorder %s1142_s3, %s801_s9 }
  0x36   : > { %p798_p0 = pnand %p796_p12, %p782_p13  ;;  %p804_p3 = scmp.lt.s32.totalorder %s802_s25, %s795_s10 }
  0x38   : > { %p799_p5 = pneg %p798_p0  ;;  %p805_p4 = por %p804_p3, %p803_p6 }
  0x3a   : > { %p806_p8 = pnand %p805_p4, %p799_p5 }
  0x3c   : > { %809 = shalt.err (!%p806_p8)
}
  0x3d   : > { %s993_s11 = smov 384   ;;  %s1419_s29 = smov 128  }
  0x3e   : > { %s1420_s2 = smov 8   ;;  %p223_p2 = scmp.lt.s32.totalorder %s990_s28, 10 }
  0x3f   : > { %652 = dma.hbm_to_vmem [thread:$0]  (!%p1137_p10), %s1147_s5, 256, %s1142_s3, %s1150_s7, %s993_s11, %s1419_s29, %s1420_s2  }
  0x40   : > { %p1183_p5 = pnand %p542_p11, %p223_p2  ;;  %s531_s14 = sadd.s32 4294967295, %s990_s28  }
  0x41   : > { %s532_s10 = sadd.s32 4294967294, %s990_s28   ;;  %p58_p6 = scmp.eq.s32.totalorder %s531_s14, 0 }
  0x42   : > { %s70_s8 = sadd.s32 1, %s958_s20  ;;  %p1439_p7 = scmp.eq.s32.totalorder %s1107_s6, 0 }
  0x43   : > { %p1440_p13 = scmp.ne.s32.totalorder %s966_s22, %s962_s21  ;;  %p77_p10 = scmp.ne.s32.totalorder %s958_s20, %s954_s19 }
  0x44   : > { %s1193_s9 = scalar_select %p1439_p7, %s958_s20, %s70_s8  }
  0x45   : > { %p1198_p1 = por %p58_p6, %p1440_p13  ;;  %p83_p11 = scmp.ne.s32.totalorder %s954_s19, %s950_s18 }
  0x46   : > { %p148_p9 = scmp.ne.s32.totalorder %s946_s17, %s942_s16  ;;  %p1442_p12 = scmp.eq.s32.totalorder %s990_s28, 0 }
  0x47   : > { %s1441_s4 = scalar_select %p1198_p1, 1, 0 }
  0x48   : > { %p79_p0 = por %p77_p10, %p1442_p12  ;;  %p149_p3 = scmp.eq.s32.totalorder %s531_s14, 8 }
  0x49   : > { %p1210_p4 = por %p83_p11, %p58_p6  ;;  %p154_p8 = scmp.ne.s32.totalorder %s942_s16, %s938_s15 }
  0x4a   : > { %p1216_p2 = por %p149_p3, %p148_p9  ;;  %p155_p7 = scmp.eq.s32.totalorder %s532_s10, 8 }
  0x4b   : > { %s1443_s3 = scalar_select %p1210_p4, 1, 0 }
  0x4c   : > { %s1444_s6 = scalar_select %p1216_p2, 1, 0 }
  0x4d   : > { %s204_s21 = sand.u32 1, %s958_s20   ;;  %s555_s5 = sshll.u32 %s982_s26, 11 }
  0x4e   : > { %p1222_p13 = por %p155_p7, %p154_p8  ;;  %s539_s18 = sshll.u32 %s204_s21, 7 }
  0x4f   : > { %s1229_s14 = scalar_lea.hbm %s1410_s1, %s555_s5  ;;  %p1446_p6 = scmp.lt.s32.totalorder %s990_s28, 9 }
  0x50   : > { %s1445_s7 = scalar_select %p1222_p13, 1, 0 }
  0x51   : > { %p1233_p10 = pnand %p1446_p6, %p79_p0  ;;  %s208_s10 = scalar_lea.vmem [#allocation6], %s539_s18 }
  0x52   : > { %s215_s29 = sshll.u32 %s208_s10, 4  ;;  %s1239_s2 = scalar_lea.sflag [#allocation7], %s204_s21  ;;  %s1237_s29 = int_to_ptr.vmem [resolvable:$true] %s215_s29 }
  0x53   : > { %s810_s25 = scalar_lea.hbm %s1229_s14, 2048  ;;  %p812_p9 = pneg %p1233_p10 }
  0x54   : > { %p811_p11 = scmp.ne.s32.totalorder %s1229_s14, %s810_s25  ;;  %s815_s0 = scalar_lea.hbm %s1410_s1, 6144 }
  0x55   : > { %p816_p0 = scmp.lt.u32.totalorder %s1229_s14, %s1410_s1  ;;  %p817_p8 = scmp.lt.u32.totalorder %s815_s0, %s810_s25 }
  0x56   : > { %p813_p12 = pnand %p812_p9, %p811_p11  ;;  %p819_p6 = scmp.lt.u32.totalorder %s810_s25, %s1229_s14 }
  0x57   : > { %p818_p7 = por %p817_p8, %p816_p0 }
  0x58   : > { %p814_p3 = pneg %p813_p12 }
  0x59   : > { %p820_p13 = por %p819_p6, %p818_p7 }
  0x5b   : > { %p821_p2 = pnand %p820_p13, %p814_p3 }
  0x5d   : > { %824 = shalt.err (!%p821_p2)
}
  0x5e   : > { %s825_s21 = scalar_lea.vmem %s1237_s29, 2048  ;;  %s996_s18 = smov [#allocation6]  }
  0x5f   : > { %p826_p11 = scmp.ne.s32.totalorder %s1237_s29, %s825_s21  ;;  %s830_s10 = sshll.u32 %s996_s18, 4  ;;  %s831_s10 = int_to_ptr.vmem [resolvable:$false] %s830_s10 }
  0x60   : > { %s832_s26 = scalar_lea.vmem %s831_s10, 4096  ;;  %p833_p1 = scmp.lt.s32.totalorder %s1237_s29, %s831_s10 }
  0x61   : > { %p828_p12 = pnand %p826_p11, %p812_p9  ;;  %p834_p0 = scmp.lt.s32.totalorder %s832_s26, %s825_s21 }
  0x63   : > { %p829_p4 = pneg %p828_p12  ;;  %p835_p8 = por %p834_p0, %p833_p1 }
  0x65   : > { %p836_p7 = pnand %p835_p8, %p829_p4 }
  0x67   : > { %839 = shalt.err (!%p836_p7)
}
  0x68   : > { %s1448_s0 = smov 8   ;;  %s1449_s27 = smov 128  }
  0x69   : > { %655 = dma.hbm_to_vmem [thread:$0]  (!%p1233_p10), %s1229_s14, 2048, %s1237_s29, %s1239_s2, %s1449_s27, %s1449_s27, %s1448_s0  }
  0x6a   : > { %227 = sbr.rel (%p1183_p5) target bundleno = 420 (0x1a4), region = 36  ;;  %s229_s25 = sand.u32 (!%p1183_p5), 1, %s966_s22  }
  0x6b   : > { %s1273_s5 = sshll.u32 (!%p1183_p5), %s229_s25, 4  ;;  %s230_s11 = scalar_lea.sflag (!%p1183_p5), [#allocation4], %s229_s25 }
  0x6c   : > { %s233_s21 = scalar_lea.vmem (!%p1183_p5), [#allocation3], %s1273_s5  ;;  %p1450_p1 = scmp.ne.s32.totalorder (!%p1183_p5), %s1441_s4, 0 }
  0x71   : > { %925 = dma.done.wait (%p1450_p1), %s230_s11, 256  }
  0x72   : > { %927 = vsyncadd (%p1450_p1), %s230_s11, 4294967040  ;;  %s238_s8 = sand.u32 1, %s954_s19   ;;  %p1451_p5 = scmp.ne.s32.totalorder %s1443_s3, 0 }
  0x73   : > { %s544_s29 = sshll.u32 %s238_s8, 7  ;;  %s239_s2 = scalar_lea.sflag [#allocation7], %s238_s8 }
  0x74   : > { %s1281_s30 = scalar_lea.vmem [#allocation6], %s544_s29 }
  0x75   : > { %929 = dma.done.wait (%p1451_p5), %s239_s2, 2048  }
  0x76   : > { %931 = vsyncadd (%p1451_p5), %s239_s2, 4294965248  ;;  %s269_s14 = sand.u32 1, %s942_s16   ;;  %p546_p4 = scmp.ne.s32.totalorder %s974_s24, 0 }
  0x77   : > { %s545_s18 = sshll.u32 %s269_s14, 4  ;;  %v997_v0 = vmov (!%p546_p4), 0.0  }
  0x78   : > { %s1290_s10 = scalar_lea.vmem [#allocation8], %s545_s18  ;;  %278 = sbr.rel (%p546_p4) target bundleno = 127 (0x7f), region = 48  ;;  %279 = vst [vmem:[#allocation2] sm:$0xff] (!%p546_p4), %v997_v0  ;;  %280 = vst [vmem:[#allocation2 + $0x8] sm:$0xff] (!%p546_p4), %v997_v0 }
  0x7f PF: > { %v285_v1 = vld [vmem:[%s1281_s30] sm:$0xff]  ;;  %v286_v2 = vld [vmem:[%s1281_s30 + $0x8] sm:$0xff]  ;;  %v287_v3 = vld [vmem:[%s1281_s30 + $0x10] sm:$0xff]  ;;  %p547_p2 = scmp.ne.s32.totalorder %s974_s24, 2 }
  0x80   : > { %v610_v4 = vpack.c.bf16 %v286_v2, %v285_v1  ;;  %v288_v5 = vld [vmem:[%s1281_s30 + $0x18] sm:$0xff]  ;;  %v289_v7 = vld [vmem:[%s1281_s30 + $0x20] sm:$0xff]  ;;  %v290_v8 = vld [vmem:[%s1281_s30 + $0x28] sm:$0xff]  ;;  %s1452_s26 = sld [smem:[#allocation18_spill]] (!%p547_p2)  ;;  %s1453_s25 = sld [smem:[#allocation19_spill]] (!%p547_p2) }
  0x81   : > { %v614_v6 = vpack.c.bf16 %v288_v5, %v287_v3  ;;  %v618_v9 = vpack.c.bf16 %v290_v8, %v289_v7  ;;  %v283_v10 = vld [vmem:[%s233_s21] sm:$0xff]  ;;  %v292_v12 = vld [vmem:[%s1281_s30 + $0x38] sm:$0xff]  ;;  %v294_v15 = vld [vmem:[%s1281_s30 + $0x48] sm:$0xff] }
  0x82   : > { %611 = vmatprep.subr.bf16.mxu0 %v610_v4  ;;  %v291_v11 = vld [vmem:[%s1281_s30 + $0x30] sm:$0xff]  ;;  %607 = vmatprep.mubr.f32.mxu0 %v283_v10  ;;  %v293_v14 = vld [vmem:[%s1281_s30 + $0x40] sm:$0xff]  ;;  %v296_v18 = vld [vmem:[%s1281_s30 + $0x58] sm:$0xff] }
  0x83   : > { %613 = vmatpush3.bf16.msra.mxu0 %v610_v4  ;;  %v622_v13 = vpack.c.bf16 %v292_v12, %v291_v11  ;;  %v626_v16 = vpack.c.bf16 %v294_v15, %v293_v14  ;;  %v295_v17 = vld [vmem:[%s1281_s30 + $0x50] sm:$0xff]  ;;  %v297_v20 = vld [vmem:[%s1281_s30 + $0x60] sm:$0xff]  ;;  %v298_v21 = vld [vmem:[%s1281_s30 + $0x68] sm:$0xff] }
  0x84   : > { %615 = vmatprep.subr.bf16.mxu0 %v614_v6  ;;  %v630_v19 = vpack.c.bf16 %v296_v18, %v295_v17  ;;  %v634_v22 = vpack.c.bf16 %v298_v21, %v297_v20  ;;  %v299_v23 = vld [vmem:[%s1281_s30 + $0x70] sm:$0xff]  ;;  %v300_v24 = vld [vmem:[%s1281_s30 + $0x78] sm:$0xff] }
  0x85   : > { %v638_v25 = vpack.c.bf16 %v300_v24, %v299_v23  ;;  %v284_v26 = vld [vmem:[%s233_s21 + $0x8] sm:$0xff]  ;;  %v281_v28 = vld [vmem:[#allocation2] sm:$0xff] }
  0x86   : > { %v282_v27 = vld [vmem:[#allocation2 + $0x8] sm:$0xff]  ;;  %v548_v34 = vld [vmem:[%s1452_s26] ss:$0 sm:$0xff] (!%p547_p2) }
  0x87   : > { %617 = vmatpush3.bf16.msra.mxu0 %v614_v6  ;;  %v549_v35 = vld [vmem:[%s1453_s25] ss:$0 sm:$0xff] (!%p547_p2) }
  0x88   : > { %619 = vmatprep.subr.bf16.mxu0 %v618_v9 }
  0x8b   : > { %621 = vmatpush3.bf16.msra.mxu0 %v618_v9 }
  0x8c   : > { %623 = vmatprep.subr.bf16.mxu0 %v622_v13 }
  0x8f   : > { %625 = vmatpush3.bf16.msra.mxu0 %v622_v13 }
  0x90   : > { %627 = vmatprep.subr.bf16.mxu0 %v626_v16 }
  0x93   : > { %629 = vmatpush3.bf16.msra.mxu0 %v626_v16 }
  0x94   : > { %631 = vmatprep.subr.bf16.mxu0 %v630_v19 }
  0x97   : > { %633 = vmatpush3.bf16.msra.mxu0 %v630_v19 }
  0x98   : > { %635 = vmatprep.subr.bf16.mxu0 %v634_v22 }
  0x9b   : > { %637 = vmatpush3.bf16.msra.mxu0 %v634_v22 }
  0x9c   : > { %639 = vmatprep.subr.bf16.mxu0 %v638_v25 }
  0x9f   : > { %641 = vmatpush3.bf16.msra.mxu0 %v638_v25 }
  0xa2   : > { %608 = vmatmul.mubr.f32.vlgmr.msra.gmra.mrb[0].mxu0 %v284_v26 }
 0x173   : > { %383 = sbr.rel (%p547_p2) target bundleno = 392 (0x188), region = 52 }
 0x175   : > { %v609_v29 = vpop.f32.mrb[0].mxu0 }
 0x176   : > { %v377_v30 = vadd.f32 %v609_v29, %v282_v27  ;;  %v367_v31 = vpop.f32.mrb[1].mxu0 }
 0x177   : > { %v376_v32 = vadd.f32 %v367_v31, %v281_v28 }
 0x178   : > { %379 = vst [vmem:[#allocation2 + $0x8] sm:$0xff] %v377_v30 }
 0x179   : > { %378 = vst [vmem:[#allocation2] sm:$0xff] %v376_v32 }
 0x17f   : > { %v385_v37 = vld [vmem:[#allocation2 + $0x8] sm:$0xff] }
 0x180   : > { %v384_v33 = vld [vmem:[#allocation2] sm:$0xff]  ;;  %v394_v38 = vmul.f32 %v548_v34, %v385_v37 }
 0x181   : > { %v393_v36 = vmul.f32 %v548_v34, %v384_v33 }
 0x182   : > { %v403_v40 = vadd.f32 %v549_v35, %v394_v38 }
 0x183   : > { %v402_v39 = vadd.f32 %v549_v35, %v393_v36 }
 0x184   : > { %v405_v42 = vmax.f32 %v403_v40, 0.0 }
 0x185   : > { %v404_v41 = vmax.f32 %v402_v39, 0.0 }
 0x186   : > { %407 = vst [vmem:[%s1290_s10 + $0x8] sm:$0xff] %v405_v42 }
 0x187   : > { %406 = vst [vmem:[%s1290_s10] sm:$0xff] %v404_v41 }
 0x188 PF: > { %s1454_s24 = sld [smem:[#allocation12_spill]]  ;;  %s1455_s8 = sld [smem:[#allocation20_spill]] }
 0x189   : > { %s422_s2 = sshll.u32 %s1290_s10, 4  ;;  %s1333_s30 = scalar_lea.sflag [#allocation5], %s269_s14  ;;  %s1329_s2 = int_to_ptr.vmem [resolvable:$true] %s422_s2 }
 0x18a   : > { %s840_s18 = scalar_lea.vmem %s1329_s2, 256  ;;  %p1456_p10 = scmp.ne.s32.totalorder %s1444_s6, 0 }
 0x18b   : > { %p841_p13 = scmp.ne.s32.totalorder %s1329_s2, %s840_s18  ;;  %s998_s4 = smov [#allocation8]  }
 0x18c   : > { %s844_s3 = sshll.u32 %s998_s4, 4  ;;  %s845_s3 = int_to_ptr.vmem [resolvable:$false] %s844_s3 }
 0x18d   : > { %p842_p9 = pnand %p841_p13, %p1456_p10  ;;  %s846_s26 = scalar_lea.vmem %s845_s3, 512 }
 0x18e   : > { %s556_s5 = sshll.u32 %s1454_s24, 8  ;;  %p847_p6 = scmp.lt.s32.totalorder %s1329_s2, %s845_s3 }
 0x18f   : > { %s1326_s29 = scalar_lea.hbm %s1455_s8, %s556_s5  ;;  %p843_p3 = pneg %p842_p9 }
 0x190   : > { %p848_p11 = scmp.lt.s32.totalorder %s846_s26, %s840_s18 }
 0x192   : > { %p849_p12 = por %p848_p11, %p847_p6 }
 0x194   : > { %p850_p0 = pnand %p849_p12, %p843_p3 }
 0x196   : > { %853 = shalt.err (!%p850_p0)
}
 0x197   : > { %s854_s14 = scalar_lea.hbm %s1326_s29, 256  ;;  %s858_s27 = scalar_lea.hbm %s1455_s8, 768 }
 0x198   : > { %p855_p8 = scmp.ne.s32.totalorder %s1326_s29, %s854_s14  ;;  %p859_p5 = scmp.lt.u32.totalorder %s1326_s29, %s1455_s8 }
 0x199   : > { %p860_p4 = scmp.lt.u32.totalorder %s858_s27, %s854_s14  ;;  %p862_p13 = scmp.lt.u32.totalorder %s854_s14, %s1326_s29 }
 0x19a   : > { %p856_p7 = pnand %p855_p8, %p1456_p10 }
 0x19b   : > { %p861_p2 = por %p860_p4, %p859_p5 }
 0x19c   : > { %p857_p1 = pneg %p856_p7 }
 0x19d   : > { %p863_p9 = por %p862_p13, %p861_p2 }
 0x19f   : > { %p864_p3 = pnand %p863_p9, %p857_p1 }
 0x1a1   : > { %867 = shalt.err (!%p864_p3)
}
 0x1a2   : > { %s999_s5 = smov 128   ;;  %s1000_s11 = smov 8  }
 0x1a3   : > { %647 = dma.vmem_to_hbm [thread:$0]  (%p1456_p10), %s1329_s2, 256, %s1326_s29, %s1333_s30, %s999_s5, %s999_s5, %s1000_s11  }
 0x1a4 PF: > { %p661_p6 = scmp.ge.s32.totalorder %s990_s28, 2  ;;  %s437_s21 = sand.u32 1, %s938_s15  }
 0x1a5   : > { %p1457_p11 = scmp.ne.s32.totalorder %s1445_s7, 0  ;;  %s438_s18 = scalar_lea.sflag [#allocation5], %s437_s21 }
 0x1a7   : > { %p657_p12 = pnand %p661_p6, %p1457_p11 }
 0x1a9   : > { %933 = dma.done.wait (!%p657_p12), %s438_s18, 256  }
 0x1aa   : > { %935 = vsyncadd (!%p657_p12), %s438_s18, 4294967040  ;;  %s23_s28 = sadd.s32 1, %s990_s28   ;;  %s1459_s24 = sld [smem:[#allocation13_spill]] }
 0x1ab   : > { %p1362_p0 = scmp.ge.s32.totalorder %s23_s28, 11   ;;  %s1460_s25 = sld [smem:[#allocation14_spill]] }
 0x1ac   : > { %s1461_s26 = sld [smem:[#allocation15_spill]]  ;;  %s1462_s27 = sld [smem:[#allocation16_spill]] }
 0x1ad   : > { %s1463_s15 = smov %s942_s16  ;;  %s1464_s16 = smov %s946_s17 }
 0x1ae   : > { %s1465_s17 = smov %s1127_s12  ;;  %s1466_s18 = smov %s954_s19 }
 0x1af   : > { %s1467_s19 = smov %s958_s20  ;;  %s1468_s20 = smov %s1193_s9 }
 0x1b0   : > { %s1469_s21 = smov %s966_s22  ;;  %s1470_s22 = smov %s970_s23 }
 0x1b1   : > { %s1471_s23 = smov %s1130_s13  ;;  %22 = sbr.rel (!%p1362_p0) target bundleno = 17 (0x11), region = 102 }
 0x1b8   :  { %443 = vsyncpa [#allocation4], 1 }
 0x1b9   :  { %445 = vsyncpa [#allocation4 + $0x1], 1 }
 0x1ba   :  { %446 = vsyncpa [#allocation7], 1 }
 0x1bb   :  { %448 = vsyncpa [#allocation7 + $0x1], 1 }
 0x1bc   :  { %449 = vsyncpa [#allocation5], 1 }
 0x1bd   :  { %451 = vsyncpa [#allocation5 + $0x1], 1 }

</bundles_post_ra>
